<compile_context>
chip_gen: v7x
topology: tpu7x:2x2x1
jax: 0.10.0
libtpu: 0.0.40
codegen_flags: <defaults>
</compile_context>

<pallas_src>
import numpy as np
import jax
import jax.numpy as jnp
from jax import lax
from jax.experimental import pallas as pl
from jax.experimental.pallas import tpu as pltpu


# ----------------------------- Pallas kernel --------------------------------

def _arap_terms_kernel(vd_ref, vdn_ref, wbn_ref, w_ref, out_ref):
    K = w_ref.shape[0]
    vd = vd_ref[...]            # (3, T)
    vdn = vdn_ref[...]          # (3K, T)  coord-major: rows a*K .. a*K+K-1 = coord a
    wbn = wbn_ref[...]          # (3K, T)  = w * (base neighbor - base vertex)
    w = w_ref[...]              # (K, T)

    # deformed edges e', one (K, T) stack per coordinate (static sublane slices)
    rot = [vdn[a * K:(a + 1) * K, :] - vd[a:a + 1, :] for a in range(3)]
    wbase = [wbn[a * K:(a + 1) * K, :] for a in range(3)]            # w-weighted base edges

    rows = []
    for a in range(3):
        for b in range(3):
            # S[a,b] = sum_k e'_k[a] * (w_k * e_k[b])
            rows.append(jnp.sum(rot[a] * wbase[b], axis=0, keepdims=True))
    # c' = sum_k w_k ||e'_k||^2   (w==0 zeroes padded slots)
    rows.append(jnp.sum(w * (rot[0] * rot[0] + rot[1] * rot[1] + rot[2] * rot[2]),
                        axis=0, keepdims=True))
    out_ref[...] = jnp.concatenate(rows, axis=0)     # single (10, T) lane-dense store


# ------------------------------ tiling helpers --------------------------------

_LANE = 128
_VMEM_BUDGET_BYTES = 40 * 1024 * 1024      # data budget used when capping the tile
_VMEM_LIMIT_MAX_BYTES = 48 * 1024 * 1024   # explicit scoped-VMEM request (fits v5e/v6e/v7x)
_MIN_SPLIT_LANES = 8192                    # above 2x this, always give v7x's 2 TCs >=2 blocks


def _choose_tile(N, K, requested=16384):
    """Lane tile (multiple of 128) sized from an explicit VMEM budget, with an even grid
    length for large meshes so the 'parallel' axis shards cleanly over v7x's two TCs."""
    lane_pad = pl.cdiv(N, _LANE) * _LANE
    # f32 bytes/lane: double-buffered inputs (3 + 7K rows) + output (10 rows)
    # + in-kernel temporaries (~4K rows) + slack.
    per_lane = (2 * (3 + 7 * K + 10) + 4 * K + 8) * 4
    cap = max(_LANE, (_VMEM_BUDGET_BYTES // per_lane) // _LANE * _LANE)
    tile = max(_LANE, (int(requested) // _LANE) * _LANE)
    tile = min(tile, cap, lane_pad)
    steps = pl.cdiv(lane_pad, tile)
    if steps == 1 and lane_pad >= 2 * _MIN_SPLIT_LANES:
        steps = 2                       # let v7x's two TCs split large single-block meshes
    if steps > 1 and steps % 2:
        steps += 1                      # even grid for v7x's 2 TCs; harmless on v5e/v6e
    tile = pl.cdiv(pl.cdiv(lane_pad, steps), _LANE) * _LANE
    npad = tile * steps
    vmem_limit = int(min(_VMEM_LIMIT_MAX_BYTES,
                         max(32 * 1024 * 1024, per_lane * tile * 5 // 4)))
    return tile, npad, steps, vmem_limit


# ------------------------------ packing (JAX) ---------------------------------

def _pack_base(v_base, nbrs, wgts, tile=16384):
    """One-time, base-mesh-constant precompute (cached across calls)."""
    v_base = jnp.asarray(v_base, jnp.float32)
    nbrs = jnp.asarray(nbrs, jnp.int32)
    wgts = jnp.asarray(wgts, jnp.float32)
    N, K = int(nbrs.shape[0]), int(nbrs.shape[1])
    blk, npad, grid, vmem_limit = _choose_tile(N, K, tile)
    # neighbor index table, transposed + lane padded (pad slots -> vertex 0, weight 0)
    nbrs_pad = jnp.zeros((K, npad), jnp.int32).at[:, :N].set(nbrs.T)
    e = v_base[nbrs] - v_base[:, None, :]                            # (N, K, 3) base edges
    c_base = jnp.sum(wgts * jnp.sum(e * e, axis=-1), axis=-1)        # (N,)  sum_k w ||e||^2
    wbn = jnp.transpose(e * wgts[..., None], (2, 1, 0)).reshape(3 * K, N)
    wbn = jnp.pad(wbn, ((0, 0), (0, npad - N)))                      # (3K, npad) coord-major
    w = jnp.pad(wgts.T, ((0, 0), (0, npad - N)))                     # (K, npad)
    return dict(wbn=wbn, w=w, c_base=c_base, nbrs_pad=nbrs_pad,
                N=N, K=K, tile=blk, npad=npad, grid=grid, vmem_limit=vmem_limit)


def _pack_def(v_def, nbrs_pad, npad, N):
    """Per-call deformed-side packing: a single gather into kernel layout, no transpose/pad
    of the big (3K, npad) array."""
    K = int(nbrs_pad.shape[0])
    vd_t = jnp.asarray(v_def, jnp.float32).T                  # (3, N) coord-major
    vdn = vd_t[:, nbrs_pad].reshape(3 * K, npad)               # (3K, npad), already lane padded
    vd = jnp.pad(vd_t, ((0, 0), (0, npad - N)))                # (3, npad)
    return vd, vdn


# ------------------------------ pallas wrapper ---------------------------------

def arap_terms_pallas(vd, vdn, base):
    """One fused HBM pass: returns (tmp (N,3,3), c_def (N,), cov_flat (N,9))."""
    K, N = base["K"], base["N"]
    tile, npad, grid = base["tile"], base["npad"], base["grid"]
    out = pl.pallas_call(
        _arap_terms_kernel,
        out_shape=jax.ShapeDtypeStruct((10, npad), jnp.float32),
        grid=(grid,),
        in_specs=[pl.BlockSpec((3, tile), lambda i: (0, i)),
                  pl.BlockSpec((3 * K, tile), lambda i: (0, i)),
                  pl.BlockSpec((3 * K, tile), lambda i: (0, i)),
                  pl.BlockSpec((K, tile), lambda i: (0, i))],
        out_specs=pl.BlockSpec((10, tile), lambda i: (0, i)),
        compiler_params=pltpu.CompilerParams(
            dimension_semantics=("parallel",),
            vmem_limit_bytes=base["vmem_limit"]),
    )(vd, vdn, base["wbn"], base["w"])
    cov_flat = out[:9, :N].T                       # (N, 9), column 3a+b = S[a,b]
    return cov_flat.reshape(N, 3, 3), out[9, :N], cov_flat


# ------------------------- rotation fit (plain JAX) -----------------------------
# TODO(synk): batched 3x3 rotation fitting (polar / SVD + det fix) has no clean Pallas TPU
# equivalent; kept in plain JAX (the fast polar path is only 3x3 elementwise math + matmuls).

def _det3(m):
    return (m[..., 0, 0] * (m[..., 1, 1] * m[..., 2, 2] - m[..., 1, 2] * m[..., 2, 1])
            - m[..., 0, 1] * (m[..., 1, 0] * m[..., 2, 2] - m[..., 1, 2] * m[..., 2, 0])
            + m[..., 0, 2] * (m[..., 1, 0] * m[..., 2, 1] - m[..., 1, 1] * m[..., 2, 0]))


def _inv_transpose3(m, eps=1e-30):
    """(M^{-1})^T = cofactor(M) / det(M), closed form for batched 3x3."""
    c00 = m[..., 1, 1] * m[..., 2, 2] - m[..., 1, 2] * m[..., 2, 1]
    c01 = -(m[..., 1, 0] * m[..., 2, 2] - m[..., 1, 2] * m[..., 2, 0])
    c02 = m[..., 1, 0] * m[..., 2, 1] - m[..., 1, 1] * m[..., 2, 0]
    c10 = -(m[..., 0, 1] * m[..., 2, 2] - m[..., 0, 2] * m[..., 2, 1])
    c11 = m[..., 0, 0] * m[..., 2, 2] - m[..., 0, 2] * m[..., 2, 0]
    c12 = -(m[..., 0, 0] * m[..., 2, 1] - m[..., 0, 1] * m[..., 2, 0])
    c20 = m[..., 0, 1] * m[..., 1, 2] - m[..., 0, 2] * m[..., 1, 1]
    c21 = -(m[..., 0, 0] * m[..., 1, 2] - m[..., 0, 2] * m[..., 1, 0])
    c22 = m[..., 0, 0] * m[..., 1, 1] - m[..., 0, 1] * m[..., 1, 0]
    cof = jnp.stack([jnp.stack([c00, c01, c02], -1),
                     jnp.stack([c10, c11, c12], -1),
                     jnp.stack([c20, c21, c22], -1)], -2)
    det = m[..., 0, 0] * c00 + m[..., 0, 1] * c01 + m[..., 0, 2] * c02
    det = jnp.where(jnp.abs(det) < eps, eps, det)
    return cof / det[..., None, None]


def _polar_rotations(tmp, iters=10):
    """Batched scaled-Newton (Higham) polar decomposition; for det(tmp) > 0 the orthogonal
    polar factor is the best-fit (Kabsch) rotation."""
    X = tmp
    for _ in range(iters):
        Y = _inv_transpose3(X)
        nx = jnp.sqrt(jnp.sum(X * X, axis=(-2, -1), keepdims=True))
        ny = jnp.sqrt(jnp.sum(Y * Y, axis=(-2, -1), keepdims=True))
        g = jnp.sqrt(jnp.maximum(ny, 1e-30) / jnp.maximum(nx, 1e-30))
        X = 0.5 * (g * X + Y / g)
    return X


def _svd_rotations(tmp):
    """Literal translation of the torch code's SVD + det-fix path (robust fallback)."""
    U, _, Vt = jnp.linalg.svd(tmp)
    Ut = jnp.swapaxes(U, -1, -2)
    R = jnp.swapaxes(jnp.matmul(Vt, Ut), -1, -2)
    dets = _det3(R)
    last_Vt = Vt[:, -1, :] * dets[:, None]
    Vt = jnp.concatenate([Vt[:, :-1, :], last_Vt[:, None, :]], axis=1)
    return jnp.swapaxes(jnp.matmul(Vt, Ut), -1, -2)


def _rotations_from_cov(tmp, method="auto"):
    if method == "svd":
        return _svd_rotations(tmp)
    if method == "polar":
        return _polar_rotations(tmp)
    # auto: fast polar path when every covariance is safely non-degenerate with positive
    # determinant (then polar == det-fixed best-fit rotation); otherwise SVD fallback.
    scale = jnp.maximum(jnp.max(jnp.abs(tmp), axis=(-2, -1)), 1e-20)
    det_n = _det3(tmp / scale[:, None, None])
    ok = jnp.all(det_n > 1e-4)
    return lax.cond(ok, _polar_rotations, _svd_rotations, tmp)


def _energy_from_terms(tmp, c_def, c_base, cov_flat, rot_method="auto"):
    R = _rotations_from_cov(tmp, rot_method)
    # E_n = ||e'||^2-term + ||e||^2-term - 2 * tr(R^T S); clamp f32 cancellation noise at 0.
    energy = c_def + c_base - 2.0 * jnp.sum(R.reshape(-1, 9) * cov_flat, axis=1)
    return jnp.maximum(energy, 0.0), R


def arap_loss_pallas(v_def, v_base, nbrs, wgts, tile=16384, rot_method="auto"):
    base = _pack_base(v_base, nbrs, wgts, tile)
    vd, vdn = _pack_def(v_def, base["nbrs_pad"], base["npad"], base["N"])
    tmp, c_def, cov_flat = arap_terms_pallas(vd, vdn, base)
    energy, _ = _energy_from_terms(tmp, c_def, base["c_base"], cov_flat, rot_method)
    return jnp.mean(energy)


# ------------------ cotangent-Laplacian precompute (NumPy) -------------------
# Mirrors laplacian_cot(): done once, under torch.no_grad() in the original.
# TODO(synk): dense (N,N) adjacency + per-vertex Python loop is O(N^2) host work; fine for
# toy meshes, replace with a sparse build for real meshes (host precompute, not the kernel).

def cot_laplacian_neighbors(verts, faces):
    v0, v1, v2 = verts[faces[:, 0]], verts[faces[:, 1]], verts[faces[:, 2]]
    A = np.linalg.norm(v1 - v2, axis=1)
    B = np.linalg.norm(v0 - v2, axis=1)
    C = np.linalg.norm(v0 - v1, axis=1)
    s = 0.5 * (A + B + C)
    area = np.sqrt(np.clip(s * (s - A) * (s - B) * (s - C), 1e-12, None))
    A2, B2, C2 = A * A, B * B, C * C
    cot = np.stack([B2 + C2 - A2, A2 + C2 - B2, A2 + B2 - C2], axis=1) / area[:, None] / 4.0
    cot = np.maximum(cot, 0.0)                    # cot[cot < 0] = 0
    Vn = verts.shape[0]
    ii = faces[:, [1, 2, 0]]
    jj = faces[:, [2, 0, 1]]
    W = np.zeros((Vn, Vn), dtype=np.float64)
    np.add.at(W, (ii.ravel(), jj.ravel()), cot.ravel())
    W = W + W.T                                   # L + L.t(), coalesced
    adj = np.zeros((Vn, Vn), dtype=bool)
    adj[ii.ravel(), jj.ravel()] = True
    adj = adj | adj.T
    deg = adj.sum(1)
    K = int(deg.max())                            # n_nbrs
    nbrs = np.zeros((Vn, K), dtype=np.int32)      # dense nbrs_s (padded with 0)
    wgts = np.zeros((Vn, K), dtype=np.float32)    # dense wgts_s (padded with 0)
    for i in range(Vn):
        js = np.nonzero(adj[i])[0]
        nbrs[i, :len(js)] = js
        wgts[i, :len(js)] = W[i, js]
    return nbrs, wgts


# ------------------------------- Arap module ---------------------------------

class Arap:
    """Mirror of the PyTorch Arap nn.Module (forward only). A mesh is (verts, faces)."""

    def __init__(self, tile=16384, rot_method="auto"):
        self.tile = tile
        self.rot_method = rot_method
        self.precomputed = None      # (nbrs, wgts), like the torch module's precompute
        self._base = None            # cached lane-packed base-mesh tensors (base is fixed)

    def __call__(self, mesh_def, mesh_base):
        v_def, _ = mesh_def
        v_base, faces = mesh_base
        if self.precomputed is None:
            nbrs, wgts = cot_laplacian_neighbors(np.asarray(v_base, np.float32),
                                                 np.asarray(faces, np.int32))
            self.precomputed = (jnp.asarray(nbrs), jnp.asarray(wgts))
        nbrs, wgts = self.precomputed
        if self._base is None:
            # Base mesh / weights are fixed across calls (same assumption the torch module
            # makes by caching wgts/nbrs) -> cache the base-side packing too.
            self._base = _pack_base(jnp.asarray(v_base), nbrs, wgts, self.tile)
        base = self._base
        vd, vdn = _pack_def(v_def, base["nbrs_pad"], base["npad"], base["N"])
        tmp, c_def, cov_flat = arap_terms_pallas(vd, vdn, base)
        energy, _ = _energy_from_terms(tmp, c_def, base["c_base"], cov_flat, self.rot_method)
        return jnp.mean(energy)


# ----------------------------------- demo ------------------------------------

def make_torus_mesh(nu=10, nv=6, R=1.0, r=0.4):
    """Torus grid mesh: every vertex has degree 6 and a non-planar neighborhood."""
    u = 2.0 * np.pi * np.arange(nu, dtype=np.float32) / nu
    v = 2.0 * np.pi * np.arange(nv, dtype=np.float32) / nv
    uu, vv = np.meshgrid(u, v, indexing="ij")
    x = (R + r * np.cos(vv)) * np.cos(uu)
    y = (R + r * np.cos(vv)) * np.sin(uu)
    z = r * np.sin(vv)
    verts = np.stack([x, y, z], axis=-1).reshape(-1, 3).astype(np.float32)
    vid = lambda i, j: (i % nu) * nv + (j % nv)
    faces = []
    for i in range(nu):
        for j in range(nv):
            faces.append([vid(i, j), vid(i + 1, j), vid(i, j + 1)])
            faces.append([vid(i, j + 1), vid(i + 1, j), vid(i + 1, j + 1)])
    return verts, np.asarray(faces, dtype=np.int32)


if __name__ == "__main__":
    # small deterministic demo mesh: 10x6 torus (60 verts, 120 faces, degree 6)
    verts_np, faces_np = make_torus_mesh(10, 6)
    v_base = jnp.asarray(verts_np)
    faces = jnp.asarray(faces_np)
    key = jax.random.PRNGKey(0)
    v_def = v_base + 0.01 * jax.random.normal(key, v_base.shape, dtype=jnp.float32)

    arap = Arap()
    loss = jax.block_until_ready(arap((v_def, faces), (v_base, faces)))

    # ---------- kernel terms vs plain-JAX reference ----------
    nbrs_j, wgts_j = arap.precomputed
    base = arap._base
    vd, vdn = _pack_def(v_def, base["nbrs_pad"], base["npad"], base["N"])
    tmp_ker, c_def_ker, cov_flat_ker = arap_terms_pallas(vd, vdn, base)

    mask = (wgts_j[..., None] != 0).astype(jnp.float32)
    base_e = v_base[nbrs_j] - v_base[:, None]
    def_e = v_def[nbrs_j] - v_def[:, None]
    mesh_hood = jnp.transpose(base_e * mask, (0, 2, 1))
    tru_hood = jnp.transpose(base_e * wgts_j[..., None], (0, 2, 1))
    rot_hood = jnp.transpose(def_e, (0, 2, 1))
    tmp_ref = rot_hood @ jnp.transpose(tru_hood, (0, 2, 1))
    np.testing.assert_allclose(np.asarray(tmp_ker), np.asarray(tmp_ref), rtol=1e-4, atol=1e-5)
    np.testing.assert_allclose(
        np.asarray(c_def_ker),
        np.asarray(jnp.sum(wgts_j * jnp.sum(def_e * def_e, -1), -1)), rtol=1e-4, atol=1e-6)
    np.testing.assert_allclose(
        np.asarray(base["c_base"]),
        np.asarray(jnp.sum(wgts_j * jnp.sum(base_e * base_e, -1), -1)), rtol=1e-4, atol=1e-6)

    # ---------- fused energy vs explicit ||e' - R e||^2 with the SAME R ----------
    energy, R = _energy_from_terms(tmp_ker, c_def_ker, base["c_base"], cov_flat_ker)
    RtR = jnp.einsum("nij,nik->njk", R, R)
    np.testing.assert_allclose(np.asarray(RtR),
                               np.tile(np.eye(3, dtype=np.float32), (base["N"], 1, 1)),
                               atol=1e-3)
    np.testing.assert_allclose(np.asarray(_det3(R)), np.ones(base["N"], np.float32), atol=1e-3)
    R_tru = R @ mesh_hood
    e_ref = jnp.sum(jnp.sum((rot_hood - R_tru) ** 2, axis=1) * wgts_j * (wgts_j != 0), axis=-1)
    np.testing.assert_allclose(np.asarray(energy), np.asarray(e_ref), rtol=1e-2, atol=1e-4)
    np.testing.assert_allclose(float(loss), float(jnp.mean(e_ref)), rtol=1e-2, atol=1e-5)
    assert np.isfinite(float(loss))

    # ---------- fast polar rotation fit vs SVD Kabsch on a well-conditioned batch ----------
    G = jax.random.normal(jax.random.PRNGKey(1), (64, 3, 3), dtype=jnp.float32)
    A = jnp.eye(3, dtype=jnp.float32)[None] + 0.1 * G            # det > 0, well conditioned
    U, _, Vh = jnp.linalg.svd(A)
    np.testing.assert_allclose(np.asarray(_rotations_from_cov(A, "auto")),
                               np.asarray(U @ Vh), atol=1e-3)

    # ---------- multi-block tiling path (even grid, padded tail block) ----------
    verts2_np, faces2_np = make_torus_mesh(24, 16)               # 384 verts
    v_base2 = jnp.asarray(verts2_np)
    nbrs2, wgts2 = cot_laplacian_neighbors(verts2_np, faces2_np)
    v_def2 = v_base2 + 0.01 * jax.random.normal(jax.random.PRNGKey(2), v_base2.shape,
                                                dtype=jnp.float32)
    base2 = _pack_base(v_base2, jnp.asarray(nbrs2), jnp.asarray(wgts2), tile=128)
    assert base2["grid"] >= 2 and base2["grid"] % 2 == 0
    vd2, vdn2 = _pack_def(v_def2, base2["nbrs_pad"], base2["npad"], base2["N"])
    tmp2, c_def2, _ = arap_terms_pallas(vd2, vdn2, base2)
    nbrs2_j = jnp.asarray(nbrs2)
    wg2 = jnp.asarray(wgts2)
    base_e2 = v_base2[nbrs2_j] - v_base2[:, None]
    def_e2 = v_def2[nbrs2_j] - v_def2[:, None]
    tmp2_ref = jnp.einsum("nka,nkb->nab", def_e2, base_e2 * wg2[..., None])
    np.testing.assert_allclose(np.asarray(tmp2), np.asarray(tmp2_ref), rtol=1e-4, atol=1e-5)
    np.testing.assert_allclose(
        np.asarray(c_def2),
        np.asarray(jnp.sum(wg2 * jnp.sum(def_e2 * def_e2, -1), -1)), rtol=1e-4, atol=1e-6)

    print("KERNEL_OK")
</pallas_src>

<mosaic_0001>
module attributes {stable_mosaic.version = 11 : i64} {
  func.func @_arap_terms_kernel(%arg0: i32, %arg1: memref<3x128xf32, #tpu.memory_space<vmem>>, %arg2: memref<18x128xf32, #tpu.memory_space<vmem>>, %arg3: memref<18x128xf32, #tpu.memory_space<vmem>>, %arg4: memref<6x128xf32, #tpu.memory_space<vmem>>, %arg5: memref<10x128xf32, #tpu.memory_space<vmem>>) attributes {dimension_semantics = [#tpu.dimension_semantics<parallel>], iteration_bounds = array<i64: 1>, scalar_prefetch = 0 : i64, scratch_operands = 0 : i64, tpu.core_type = #tpu.core_type<tc>, window_params = [{transform_indices = @transform_0, window_bounds = array<i64: 3, 128>}, {transform_indices = @transform_1, window_bounds = array<i64: 18, 128>}, {transform_indices = @transform_2, window_bounds = array<i64: 18, 128>}, {transform_indices = @transform_3, window_bounds = array<i64: 6, 128>}, {transform_indices = @transform_4, window_bounds = array<i64: 10, 128>}]} {
    %c0 = arith.constant 0 : index
    %c0_0 = arith.constant 0 : index
    %0 = vector.load %arg1[%c0, %c0_0] : memref<3x128xf32, #tpu.memory_space<vmem>>, vector<3x128xf32>
    %c0_1 = arith.constant 0 : index
    %c0_2 = arith.constant 0 : index
    %1 = vector.load %arg2[%c0_1, %c0_2] : memref<18x128xf32, #tpu.memory_space<vmem>>, vector<18x128xf32>
    %c0_3 = arith.constant 0 : index
    %c0_4 = arith.constant 0 : index
    %2 = vector.load %arg3[%c0_3, %c0_4] : memref<18x128xf32, #tpu.memory_space<vmem>>, vector<18x128xf32>
    %c0_5 = arith.constant 0 : index
    %c0_6 = arith.constant 0 : index
    %3 = vector.load %arg4[%c0_5, %c0_6] : memref<6x128xf32, #tpu.memory_space<vmem>>, vector<6x128xf32>
    %4 = vector.extract_strided_slice %1 {offsets = [0, 0], sizes = [6, 128], strides = [1, 1]} : vector<18x128xf32> to vector<6x128xf32>
    %5 = vector.extract_strided_slice %0 {offsets = [0, 0], sizes = [1, 128], strides = [1, 1]} : vector<3x128xf32> to vector<1x128xf32>
    %6 = vector.broadcast %5 : vector<1x128xf32> to vector<6x128xf32>
    %7 = arith.subf %4, %6 : vector<6x128xf32>
    %8 = vector.extract_strided_slice %1 {offsets = [6, 0], sizes = [6, 128], strides = [1, 1]} : vector<18x128xf32> to vector<6x128xf32>
    %9 = vector.extract_strided_slice %0 {offsets = [1, 0], sizes = [1, 128], strides = [1, 1]} : vector<3x128xf32> to vector<1x128xf32>
    %10 = vector.broadcast %9 : vector<1x128xf32> to vector<6x128xf32>
    %11 = arith.subf %8, %10 : vector<6x128xf32>
    %12 = vector.extract_strided_slice %1 {offsets = [12, 0], sizes = [6, 128], strides = [1, 1]} : vector<18x128xf32> to vector<6x128xf32>
    %13 = vector.extract_strided_slice %0 {offsets = [2, 0], sizes = [1, 128], strides = [1, 1]} : vector<3x128xf32> to vector<1x128xf32>
    %14 = vector.broadcast %13 : vector<1x128xf32> to vector<6x128xf32>
    %15 = arith.subf %12, %14 : vector<6x128xf32>
    %16 = vector.extract_strided_slice %2 {offsets = [0, 0], sizes = [6, 128], strides = [1, 1]} : vector<18x128xf32> to vector<6x128xf32>
    %17 = vector.extract_strided_slice %2 {offsets = [6, 0], sizes = [6, 128], strides = [1, 1]} : vector<18x128xf32> to vector<6x128xf32>
    %18 = vector.extract_strided_slice %2 {offsets = [12, 0], sizes = [6, 128], strides = [1, 1]} : vector<18x128xf32> to vector<6x128xf32>
    %19 = arith.mulf %7, %16 : vector<6x128xf32>
    %cst = arith.constant dense<0.000000e+00> : vector<128xf32>
    %20 = vector.multi_reduction <add>, %19, %cst [0] : vector<6x128xf32> to vector<128xf32>
    %21 = vector.shape_cast %20 : vector<128xf32> to vector<1x128xf32>
    %22 = arith.mulf %7, %17 : vector<6x128xf32>
    %cst_7 = arith.constant dense<0.000000e+00> : vector<128xf32>
    %23 = vector.multi_reduction <add>, %22, %cst_7 [0] : vector<6x128xf32> to vector<128xf32>
    %24 = vector.shape_cast %23 : vector<128xf32> to vector<1x128xf32>
    %25 = arith.mulf %7, %18 : vector<6x128xf32>
    %cst_8 = arith.constant dense<0.000000e+00> : vector<128xf32>
    %26 = vector.multi_reduction <add>, %25, %cst_8 [0] : vector<6x128xf32> to vector<128xf32>
    %27 = vector.shape_cast %26 : vector<128xf32> to vector<1x128xf32>
    %28 = arith.mulf %11, %16 : vector<6x128xf32>
    %cst_9 = arith.constant dense<0.000000e+00> : vector<128xf32>
    %29 = vector.multi_reduction <add>, %28, %cst_9 [0] : vector<6x128xf32> to vector<128xf32>
    %30 = vector.shape_cast %29 : vector<128xf32> to vector<1x128xf32>
    %31 = arith.mulf %11, %17 : vector<6x128xf32>
    %cst_10 = arith.constant dense<0.000000e+00> : vector<128xf32>
    %32 = vector.multi_reduction <add>, %31, %cst_10 [0] : vector<6x128xf32> to vector<128xf32>
    %33 = vector.shape_cast %32 : vector<128xf32> to vector<1x128xf32>
    %34 = arith.mulf %11, %18 : vector<6x128xf32>
    %cst_11 = arith.constant dense<0.000000e+00> : vector<128xf32>
    %35 = vector.multi_reduction <add>, %34, %cst_11 [0] : vector<6x128xf32> to vector<128xf32>
    %36 = vector.shape_cast %35 : vector<128xf32> to vector<1x128xf32>
    %37 = arith.mulf %15, %16 : vector<6x128xf32>
    %cst_12 = arith.constant dense<0.000000e+00> : vector<128xf32>
    %38 = vector.multi_reduction <add>, %37, %cst_12 [0] : vector<6x128xf32> to vector<128xf32>
    %39 = vector.shape_cast %38 : vector<128xf32> to vector<1x128xf32>
    %40 = arith.mulf %15, %17 : vector<6x128xf32>
    %cst_13 = arith.constant dense<0.000000e+00> : vector<128xf32>
    %41 = vector.multi_reduction <add>, %40, %cst_13 [0] : vector<6x128xf32> to vector<128xf32>
    %42 = vector.shape_cast %41 : vector<128xf32> to vector<1x128xf32>
    %43 = arith.mulf %15, %18 : vector<6x128xf32>
    %cst_14 = arith.constant dense<0.000000e+00> : vector<128xf32>
    %44 = vector.multi_reduction <add>, %43, %cst_14 [0] : vector<6x128xf32> to vector<128xf32>
    %45 = vector.shape_cast %44 : vector<128xf32> to vector<1x128xf32>
    %46 = arith.mulf %7, %7 : vector<6x128xf32>
    %47 = arith.mulf %11, %11 : vector<6x128xf32>
    %48 = arith.addf %46, %47 : vector<6x128xf32>
    %49 = arith.mulf %15, %15 : vector<6x128xf32>
    %50 = arith.addf %48, %49 : vector<6x128xf32>
    %51 = arith.mulf %3, %50 : vector<6x128xf32>
    %cst_15 = arith.constant dense<0.000000e+00> : vector<128xf32>
    %52 = vector.multi_reduction <add>, %51, %cst_15 [0] : vector<6x128xf32> to vector<128xf32>
    %53 = vector.shape_cast %52 : vector<128xf32> to vector<1x128xf32>
    %54 = tpu.concatenate %21, %24, %27, %30, %33, %36, %39, %42, %45, %53 in 0 : vector<1x128xf32>, vector<1x128xf32>, vector<1x128xf32>, vector<1x128xf32>, vector<1x128xf32>, vector<1x128xf32>, vector<1x128xf32>, vector<1x128xf32>, vector<1x128xf32>, vector<1x128xf32> -> vector<10x128xf32>
    %c0_16 = arith.constant 0 : index
    %c0_17 = arith.constant 0 : index
    %55 = vector.load %arg5[%c0_16, %c0_17] : memref<10x128xf32, #tpu.memory_space<vmem>>, vector<10x128xf32>
    tpu.vector_store %arg5[%c0_16, %c0_17], %54 {strides = array<i32>} : memref<10x128xf32, #tpu.memory_space<vmem>>, vector<10x128xf32>,
    return
  }
  func.func @transform_0(%arg0: i32) -> (i32, i32) {
    %c0_i32 = arith.constant 0 : i32
    %c0_i32_0 = arith.constant 0 : i32
    return %c0_i32, %arg0 : i32, i32
  }
  func.func @transform_1(%arg0: i32) -> (i32, i32) {
    %c0_i32 = arith.constant 0 : i32
    %c0_i32_0 = arith.constant 0 : i32
    return %c0_i32, %arg0 : i32, i32
  }
  func.func @transform_2(%arg0: i32) -> (i32, i32) {
    %c0_i32 = arith.constant 0 : i32
    %c0_i32_0 = arith.constant 0 : i32
    return %c0_i32, %arg0 : i32, i32
  }
  func.func @transform_3(%arg0: i32) -> (i32, i32) {
    %c0_i32 = arith.constant 0 : i32
    %c0_i32_0 = arith.constant 0 : i32
    return %c0_i32, %arg0 : i32, i32
  }
  func.func @transform_4(%arg0: i32) -> (i32, i32) {
    %c0_i32 = arith.constant 0 : i32
    %c0_i32_0 = arith.constant 0 : i32
    return %c0_i32, %arg0 : i32, i32
  }
}

</mosaic_0001>

<bundles_post_ra>
// kernel: tpu_custom_call.1
= control target key start
LH: loop header
LB: loop body
LE: loop exit
PB: predicated region body
PF: predicated region fallthrough
CT: control target
= control target key end

     0   :  { %9 = vsyncpa [#allocation3], 0  ;;  %s560_s0 = inlined_call_operand.hbm [shape: f32[3,128], index: 0, kind: input, shape index: {}]   ;;  %s561_s1 = inlined_call_operand.hbm [shape: f32[18,128], index: 1, kind: input, shape index: {}]   ;;  %s562_s2 = inlined_call_operand.hbm [shape: f32[18,128], index: 2, kind: input, shape index: {}]   ;;  %s563_s3 = inlined_call_operand.vmem [shape: f32[6,128], index: 3, kind: input, shape index: {}]   ;;  %s564_s4 = inlined_call_operand.hbm [shape: f32[10,128], index: 4, kind: output, shape index: {}]  }
   0x1   :  { %10 = vsyncpa [#allocation6], 0 }
   0x2   :  { %11 = vsyncpa [#allocation4], 0  ;;  %s381_s15 = smov [#allocation5]   ;;  %s287_s19 = scalar_lea.hbm %s561_s1, 384 }
   0x3   :  { %s27_s16 = sshll.u32 %s381_s15, 4  ;;  %p288_p0 = scmp.ne.s32.totalorder %s561_s1, %s287_s19  ;;  %s28_s16 = int_to_ptr.vmem [resolvable:$true] %s27_s16 }
   0x4   :  { %p291_p1 = scmp.lt.u32.totalorder %s287_s19, %s561_s1 }
   0x6   :  { %p293_p2 = pnand %p291_p1, %p288_p0 }
   0x8   :  { %296 = shalt.err (!%p293_p2)
}
   0x9   :  { %s297_s24 = scalar_lea.vmem %s28_s16, 384  ;;  %p302_p4 = scmp.lt.s32.totalorder %s28_s16, %s28_s16 }
   0xa   :  { %p298_p3 = scmp.ne.s32.totalorder %s28_s16, %s297_s24  ;;  %p303_p5 = scmp.lt.s32.totalorder %s297_s24, %s297_s24 }
   0xc   :  { %p304_p6 = por %p303_p5, %p302_p4 }
   0xe   :  { %p305_p7 = pnand %p304_p6, %p298_p3 }
  0x10   :  { %308 = shalt.err (!%p305_p7)
}
  0x11   :  { %s382_s25 = smov 128   ;;  %s383_s26 = smov 8  }
  0x12   :  { %33 = dma.hbm_to_vmem [thread:$0]  %s561_s1, 384, %s28_s16, [#allocation6], %s382_s25, %s382_s25, %s383_s26  }
  0x13   :  { %s384_s29 = smov [#allocation2]   ;;  %s385_s5 = smov [#allocation7]  }
  0x14   :  { %s18_s30 = sshll.u32 %s384_s29, 4  ;;  %s39_s6 = sshll.u32 %s385_s5, 4  ;;  %s19_s30 = int_to_ptr.vmem [resolvable:$true] %s18_s30  ;;  %s40_s6 = int_to_ptr.vmem [resolvable:$true] %s39_s6 }
  0x15   :  { %s309_s9 = scalar_lea.hbm %s560_s0, 64 }
  0x16   :  { %p310_p8 = scmp.ne.s32.totalorder %s560_s0, %s309_s9  ;;  %p313_p9 = scmp.lt.u32.totalorder %s309_s9, %s560_s0 }
  0x18   :  { %p315_p10 = pnand %p313_p9, %p310_p8 }
  0x1a   :  { %318 = shalt.err (!%p315_p10)
}
  0x1b   :  { %s319_s1 = scalar_lea.vmem %s19_s30, 64  ;;  %p324_p12 = scmp.lt.s32.totalorder %s19_s30, %s19_s30 }
  0x1c   :  { %p320_p11 = scmp.ne.s32.totalorder %s19_s30, %s319_s1  ;;  %p325_p13 = scmp.lt.s32.totalorder %s319_s1, %s319_s1 }
  0x1e   :  { %p326_p0 = por %p325_p13, %p324_p12 }
  0x20   :  { %p327_p1 = pnand %p326_p0, %p320_p11 }
  0x22   :  { %330 = shalt.err (!%p327_p1)
}
  0x23   :  { %21 = dma.hbm_to_vmem [thread:$0]  %s560_s0, 64, %s19_s30, [#allocation3]  }
  0x24   :  { %s331_s18 = scalar_lea.hbm %s562_s2, 384 }
  0x25   :  { %p332_p2 = scmp.ne.s32.totalorder %s562_s2, %s331_s18  ;;  %p335_p3 = scmp.lt.u32.totalorder %s331_s18, %s562_s2 }
  0x27   :  { %p337_p4 = pnand %p335_p3, %p332_p2 }
  0x29   :  { %340 = shalt.err (!%p337_p4)
}
  0x2a   :  { %s341_s23 = scalar_lea.vmem %s40_s6, 384  ;;  %p346_p6 = scmp.lt.s32.totalorder %s40_s6, %s40_s6 }
  0x2b   :  { %p342_p5 = scmp.ne.s32.totalorder %s40_s6, %s341_s23  ;;  %p347_p7 = scmp.lt.s32.totalorder %s341_s23, %s341_s23 }
  0x2d   :  { %p348_p8 = por %p347_p7, %p346_p6 }
  0x2f   :  { %p349_p9 = pnand %p348_p8, %p342_p5 }
  0x31   :  { %352 = shalt.err (!%p349_p9)
}
  0x32   :  { %45 = dma.hbm_to_vmem [thread:$0]  %s562_s2, 384, %s40_s6, [#allocation6], %s382_s25, %s382_s25, %s383_s26  }
  0x33   :  { %375 = dma.done.wait [#allocation3], 64  }
  0x34   :  { %376 = vsyncadd [#allocation3], 4294967232 }
  0x35   :  { %377 = dma.done.wait [#allocation6], 768  }
  0x36   :  { %378 = vsyncadd [#allocation6], 4294966528  ;;  %v65_v0 = vlaneseq  ;;  %v57_v5 = vld [vmem:[#allocation2] sm:$0x7]  ;;  %v58_v6 = vld [vmem:[#allocation5] sm:$0xff]  ;;  %vm83_vm0 = vcmask 1045504  }
  0x37   :  { %v59_v7 = vld [vmem:[#allocation5 + $0x8] sm:$0xff]  ;;  %vm93_vm1 = vcmask 1041408   ;;  %v60_v8 = vld [vmem:[#allocation5 + $0x10] sm:$0x3]  ;;  %v454_v9 = vld [vmem:[#allocation7] sm:$0xff]  ;;  %vm107_vm2 = vcmask 1043456  }
  0x38   :  { %v66_v1 = vshrl.u32 %v65_v0, 7  ;;  %v456_v10 = vld [vmem:[#allocation7 + $0x8] sm:$0xff]  ;;  %v458_v14 = vld [vmem:[#allocation7 + $0x10] sm:$0x3]  ;;  %v94_v15 = vrot.slane %v454_v9, 6  ;;  %v464_v18 = vrot.slane %v454_v9, 2 }
  0x39   :  { %v95_v16 = vrot.slane %v456_v10, 6  ;;  %v108_v17 = vrot.slane %v456_v10, 4  ;;  %v109_v25 = vrot.slane %v458_v14, 4  ;;  %v152_v26 = vrot.slane %v458_v14, 6 }
  0x3a   :  { %v67_v2 = vsub.s32 0, %v66_v1  ;;  %v72_v3 = vsub.s32 1, %v66_v1  ;;  %v78_v4 = vsub.s32 2, %v66_v1  ;;  %vm249_vm3 = vcmask 1040384  }
  0x3b   :  { %v96_v24 = vsel %vm93_vm1, %v94_v15, %v95_v16  ;;  %v110_v31 = vsel %vm107_vm2, %v108_v17, %v109_v25  ;;  %v153_v34 = vsel %vm93_vm1, %v95_v16, %v152_v26  ;;  %v171_v61 = vrot.slane %v454_v9, 4 }
  0x3c   :  { %v68_v11 = vrot.slane %v57_v5, %v67_v2  ;;  %v73_v12 = vrot.slane %v57_v5, %v72_v3  ;;  %v79_v13 = vrot.slane %v57_v5, %v78_v4  ;;  %v188_v62 = vrot.slane %v456_v10, 2 }
  0x3d   :  { %vm252_vm4 = vcmask 1042432   ;;  %vm255_vm5 = vcmask 1044480   ;;  %vm258_vm6 = vcmask 1046528  }
  0x3e   :  { %v466_v19 = vsub.f32 %v58_v6, %v68_v11  ;;  %v468_v20 = vsub.f32 %v58_v6, %v73_v12  ;;  %v470_v21 = vsub.f32 %v59_v7, %v73_v12  ;;  %v472_v22 = vsub.f32 %v59_v7, %v79_v13 }
  0x3f   :  { %v474_v23 = vsub.f32 %v60_v8, %v79_v13 }
  0x40   :  { %v82_v27 = vmul.f32 %v466_v19, %v454_v9  ;;  %v98_v28 = vmul.f32 %v96_v24, %v466_v19  ;;  %v122_v29 = vmul.f32 %v464_v18, %v468_v20  ;;  %v123_v30 = vmul.f32 %v464_v18, %v470_v21 }
  0x41   :  { %v137_v32 = vmul.f32 %v468_v20, %v454_v9  ;;  %v138_v33 = vmul.f32 %v470_v21, %v456_v10  ;;  %v112_v37 = vmul.f32 %v110_v31, %v466_v19  ;;  %v156_v45 = vmul.f32 %v95_v16, %v468_v20 }
  0x42   :  { %v84_v35 = vsel %vm83_vm0, %v82_v27, 0.0  ;;  %v99_v36 = vsel %vm83_vm0, %v98_v28, 0.0  ;;  %v126_v38 = vrot.slane %v122_v29, 6  ;;  %v127_v41 = vrot.slane %v123_v30, 6 }
  0x43   :  { %v85_v39 = vrot.slane %v84_v35, 4  ;;  %v100_v40 = vrot.slane %v99_v36, 4  ;;  %v141_v42 = vrot.slane %v137_v32, 6  ;;  %v113_v43 = vsel %vm83_vm0, %v112_v37, 0.0 }
  0x44   :  { %v142_v44 = vrot.slane %v138_v33, 6  ;;  %v157_v46 = vmul.f32 %v153_v34, %v470_v21  ;;  %v114_v49 = vrot.slane %v113_v43, 4  ;;  %v128_v50 = vsel %vm93_vm1, %v126_v38, %v127_v41 }
  0x45   :  { %v86_v47 = vadd.f32 %v85_v39, %v84_v35  ;;  %v101_v48 = vadd.f32 %v100_v40, %v99_v36  ;;  %v130_v51 = vsel %vm83_vm0, %v128_v50, 0.0  ;;  %v160_v53 = vrot.slane %v156_v45, 6 }
  0x46   :  { %v143_v52 = vsel %vm93_vm1, %v141_v42, %v142_v44  ;;  %v161_v54 = vrot.slane %v157_v46, 6  ;;  %v115_v57 = vadd.f32 %v114_v49, %v113_v43  ;;  %v131_v58 = vrot.slane %v130_v51, 4 }
  0x47   :  { %v87_v55 = vrot.slane %v86_v47, 2  ;;  %v102_v56 = vrot.slane %v101_v48, 2  ;;  %v145_v59 = vsel %vm83_vm0, %v143_v52, 0.0  ;;  %v173_v5 = vmul.f32 %v171_v61, %v472_v22 }
  0x48   :  { %v162_v60 = vsel %vm93_vm1, %v160_v53, %v161_v54  ;;  %v116_v1 = vrot.slane %v115_v57, 2  ;;  %v132_v2 = vadd.f32 %v131_v58, %v130_v51  ;;  %v146_v3 = vrot.slane %v145_v59, 4 }
  0x49   :  { %v88_v63 = vadd.f32 %v87_v55, %v86_v47  ;;  %v103_v0 = vadd.f32 %v102_v56, %v101_v48  ;;  %v164_v4 = vsel %vm83_vm0, %v162_v60, 0.0  ;;  %v174_v6 = vmul.f32 %v171_v61, %v474_v23 }
  0x4a   :  { %v117_v11 = vadd.f32 %v116_v1, %v115_v57  ;;  %v133_v12 = vrot.slane %v132_v2, 2  ;;  %v147_v13 = vadd.f32 %v146_v3, %v145_v59  ;;  %v165_v9 = vrot.slane %v164_v4, 4 }
  0x4b   :  { %v89_v7 = vrot.slane %v88_v63, 1  ;;  %v104_v8 = vrot.slane %v103_v0, 1  ;;  %v177_v15 = vrot.slane %v173_v5, 4  ;;  %v178_v16 = vrot.slane %v174_v6, 4 }
  0x4c   :  { %v118_v25 = vrot.slane %v117_v11, 1  ;;  %v134_v26 = vadd.f32 %v133_v12, %v132_v2  ;;  %v148_v27 = vrot.slane %v147_v13, 2  ;;  %v166_v28 = vadd.f32 %v165_v9, %v164_v4 }
  0x4d   :  { %v90_v17 = vadd.f32 %v89_v7, %v88_v63  ;;  %v105_v24 = vadd.f32 %v104_v8, %v103_v0  ;;  %v179_v29 = vsel %vm107_vm2, %v177_v15, %v178_v16  ;;  %v189_v30 = vsel %vm83_vm0, %v464_v18, %v188_v62 }
  0x4e   :  { %v119_v31 = vadd.f32 %v118_v25, %v117_v11  ;;  %v135_v32 = vrot.slane %v134_v26, 1  ;;  %v181_v33 = vsel %vm83_vm0, %v179_v29, 0.0  ;;  %v192_v34 = vmul.f32 %v189_v30, %v472_v22 }
  0x4f   :  { %v149_v35 = vadd.f32 %v148_v27, %v147_v13  ;;  %v167_v36 = vrot.slane %v166_v28, 2  ;;  %v182_v37 = vrot.slane %v181_v33, 4  ;;  %v193_v38 = vmul.f32 %v188_v62, %v474_v23  ;;  %v64_v13 = vld [vmem:[%s563_s3] sm:$0x3f]  ;;  %s386_s3 = smov [#allocation8]  }
  0x50   :  { %v136_v39 = vadd.f32 %v135_v32, %v134_v26  ;;  %v196_v40 = vrot.slane %v192_v34, 4  ;;  %v250_v41 = vsel %vm249_vm3, %v90_v17, %v105_v24  ;;  %v207_v42 = vmul.f32 %v472_v22, %v456_v10  ;;  %s268_s28 = sshll.u32 %s386_s3, 4  ;;  %s269_s28 = int_to_ptr.vmem [resolvable:$true] %s268_s28 }
  0x51   :  { %v150_v43 = vrot.slane %v149_v35, 1  ;;  %v168_v18 = vadd.f32 %v167_v36, %v166_v28  ;;  %v183_v44 = vadd.f32 %v182_v37, %v181_v33  ;;  %v197_v45 = vrot.slane %v193_v38, 4  ;;  %s353_s29 = scalar_lea.vmem %s269_s28, 256  ;;  %p358_p11 = scmp.lt.s32.totalorder %s269_s28, %s269_s28 }
  0x52   :  { %v251_v46 = vsel %vm93_vm1, %v250_v41, %v119_v31  ;;  %v208_v47 = vmul.f32 %v474_v23, %v458_v14  ;;  %v211_v48 = vrot.slane %v207_v42, 4  ;;  %v223_v55 = vmul.f32 %v468_v20, %v468_v20  ;;  %p354_p10 = scmp.ne.s32.totalorder %s269_s28, %s353_s29  ;;  %p359_p12 = scmp.lt.s32.totalorder %s353_s29, %s353_s29 }
  0x53   :  { %v151_v49 = vadd.f32 %v150_v43, %v149_v35  ;;  %v169_v50 = vrot.slane %v168_v18, 1  ;;  %v184_v51 = vrot.slane %v183_v44, 2  ;;  %v198_v52 = vsel %vm107_vm2, %v196_v40, %v197_v45 }
  0x54   :  { %v200_v53 = vsel %vm83_vm0, %v198_v52, 0.0  ;;  %v253_v10 = vsel %vm252_vm4, %v251_v46, %v136_v39  ;;  %v212_v54 = vrot.slane %v208_v47, 4  ;;  %v222_v14 = vmul.f32 %v466_v19, %v466_v19  ;;  %p360_p13 = por %p359_p12, %p358_p11 }
  0x55   :  { %v170_v56 = vadd.f32 %v169_v50, %v168_v18  ;;  %v185_v57 = vadd.f32 %v184_v51, %v183_v44  ;;  %v201_v58 = vrot.slane %v200_v53, 4  ;;  %v224_v60 = vmul.f32 %v470_v21, %v470_v21 }
  0x56   :  { %v213_v59 = vsel %vm107_vm2, %v211_v48, %v212_v54  ;;  %v227_v61 = vrot.slane %v223_v55, 6  ;;  %v232_v62 = vmul.f32 %v472_v22, %v472_v22  ;;  %v254_v1 = vsel %vm107_vm2, %v253_v10, %v151_v49  ;;  %p361_p0 = pnand %p360_p13, %p354_p10 }
  0x57   :  { %v186_v63 = vrot.slane %v185_v57, 1  ;;  %v202_v0 = vadd.f32 %v201_v58, %v200_v53  ;;  %v215_v20 = vsel %vm83_vm0, %v213_v59, 0.0  ;;  %v228_v3 = vrot.slane %v224_v60, 6 }
  0x58   :  { %v216_v2 = vrot.slane %v215_v20, 4  ;;  %v233_v19 = vmul.f32 %v474_v23, %v474_v23  ;;  %v236_v4 = vrot.slane %v232_v62, 4  ;;  %v256_v22 = vsel %vm255_vm5, %v254_v1, %v170_v56 }
  0x59   :  { %v203_v5 = vrot.slane %v202_v0, 2  ;;  %v187_v6 = vadd.f32 %v186_v63, %v185_v57  ;;  %v229_v21 = vsel %vm93_vm1, %v227_v61, %v228_v3 }
  0x5a   :  { %v217_v7 = vadd.f32 %v216_v2, %v215_v20  ;;  %v237_v8 = vrot.slane %v233_v19, 4  ;;  %v231_v12 = vadd.f32 %v229_v21, %v222_v14 }
  0x5b   :  { %v204_v11 = vadd.f32 %v203_v5, %v202_v0  ;;  %v257_v23 = vsel %vm83_vm0, %v256_v22, %v187_v6 }
  0x5c   :  { %v238_v9 = vsel %vm107_vm2, %v236_v4, %v237_v8  ;;  %v218_v17 = vrot.slane %v217_v7, 2 }
  0x5d   :  { %v205_v15 = vrot.slane %v204_v11, 1  ;;  %v240_v16 = vadd.f32 %v238_v9, %v231_v12 }
  0x5e   :  { %v219_v28 = vadd.f32 %v218_v17, %v217_v7 }
  0x5f   :  { %v206_v24 = vadd.f32 %v205_v15, %v204_v11  ;;  %v241_v25 = vmul.f32 %v240_v16, %v64_v13 }
  0x60   :  { %v220_v31 = vrot.slane %v219_v28, 1 }
  0x61   :  { %v259_v26 = vsel %vm258_vm6, %v257_v23, %v206_v24  ;;  %v242_v27 = vsel %vm83_vm0, %v241_v25, 0.0 }
  0x62   :  { %261 = vst [vmem:[#allocation8] sm:$0xff] %v259_v26  ;;  %v243_v29 = vrot.slane %v242_v27, 4  ;;  %v221_v34 = vadd.f32 %v220_v31, %v219_v28 }
  0x64   :  { %v244_v30 = vadd.f32 %v243_v29, %v242_v27 }
  0x66   :  { %v245_v32 = vrot.slane %v244_v30, 2 }
  0x68   :  { %v246_v33 = vadd.f32 %v245_v32, %v244_v30 }
  0x6a   :  { %v247_v35 = vrot.slane %v246_v33, 1 }
  0x6c   :  { %v248_v36 = vadd.f32 %v247_v35, %v246_v33 }
  0x6e   :  { %v260_v37 = vsel %vm249_vm3, %v221_v34, %v248_v36 }
  0x6f   :  { %262 = vst [vmem:[#allocation8 + $0x8] sm:$0x3] %v260_v37 }
  0x70   :  { %364 = shalt.err (!%p361_p0)
}
  0x71   :  { %s365_s6 = scalar_lea.hbm %s564_s4, 256 }
  0x72   :  { %p366_p1 = scmp.ne.s32.totalorder %s564_s4, %s365_s6  ;;  %p369_p2 = scmp.lt.u32.totalorder %s365_s6, %s564_s4 }
  0x74   :  { %p371_p3 = pnand %p369_p2, %p366_p1 }
  0x76   :  { %374 = shalt.err (!%p371_p3)
}
  0x77   :  { %274 = dma.vmem_to_hbm [thread:$0]  %s269_s28, 256, %s564_s4, [#allocation4], %s382_s25, %s382_s25, %s383_s26  }
  0x78   :  { %379 = dma.done.wait [#allocation4], 256  }
  0x79   :  { %380 = vsyncadd [#allocation4], 4294967040 }
  0x7a   :  { %278 = vsyncpa [#allocation3], 1 }
  0x7b   :  { %279 = vsyncpa [#allocation6], 1 }
  0x7c   :  { %280 = vsyncpa [#allocation4], 1 }

</bundles_post_ra>
